<compile_context>
chip_gen: v5e
topology: v5e:2x2
jax: 0.10.0
libtpu: 0.0.40
codegen_flags: <defaults>
</compile_context>

<pallas_src>
import functools

import jax
import jax.numpy as jnp
from jax import lax
from jax.experimental import pallas as pl
from jax.experimental.pallas import tpu as pltpu

D_EMB = 384       # per-embedding feature size (Linear input is 3 * 384)
_NUM_CORES = 2    # leading "parallel" grid axis; v7x has 2 TCs/chip, no-op elsewhere


def _round_up(x, m):
    return ((x + m - 1) // m) * m


def _bce_head_kernel(src_ref, tgt_ref, lab_ref, w_ref, b_ref, loss_ref,
                     *, batch, tile, tiles_per_core, mask_possible):
    # src_ref/tgt_ref: (TB, D) native dtype    lab_ref: (TB, 1) f32
    # w_ref: (3, D) f32 (resident)             b_ref: (1, 1) f32 in SMEM
    # loss_ref: (8, 128) f32 per-core resident partial-sum block
    c = pl.program_id(0)                       # core-split axis ("parallel")
    i = pl.program_id(1)                       # row-tile axis ("arbitrary")
    tile_idx = c * tiles_per_core + i          # logical (unclamped) row-tile index

    @pl.when(i == 0)
    def _():
        loss_ref[...] = jnp.zeros_like(loss_ref)

    # Upcast in-register after the (possibly bf16) DMA.
    src = src_ref[...].astype(jnp.float32)
    tgt = tgt_ref[...].astype(jnp.float32)
    w = w_ref[...]

    # Linear(1152 -> 1) on the virtual concat [src, tgt, |tgt-src|]: fused elementwise
    # accumulate + ONE cross-lane reduction per tile.
    contrib = src * w[0:1, :] + tgt * w[1:2, :] + jnp.abs(tgt - src) * w[2:3, :]
    logits = jnp.sum(contrib, axis=-1, keepdims=True) + b_ref[0, 0]        # (TB, 1)

    # BCE from logits via softplus: log(sigmoid(x)) = -softplus(-x),
    # log(1 - sigmoid(x)) = -softplus(x).  Clamp at -100 like torch.nn.BCELoss.
    abs_x = jnp.abs(logits)
    log_term = jnp.log(1.0 + jnp.exp(-abs_x))            # shared softplus tail
    log_p = jnp.maximum(-(jnp.maximum(-logits, 0.0) + log_term), -100.0)
    log_1mp = jnp.maximum(-(jnp.maximum(logits, 0.0) + log_term), -100.0)

    y = lab_ref[...]
    # Hard {0,1} labels (classification objective) -> select instead of blend.
    bce = -jnp.where(y > 0.5, log_p, log_1mp)            # (TB, 1)

    # Accumulate into the resident per-core output block.  The (1,1) tile sum
    # broadcasts across the whole (8,128) block so the final store stays full-tile
    # (no masked sub-stores); the host reads element [0,0] of each core's block.
    if mask_possible:
        needs_mask = (tile_idx + 1) * tile > batch       # scalar, only tail/OOB tiles

        @pl.when(needs_mask)
        def _():
            row = tile_idx * tile + lax.broadcasted_iota(jnp.int32, bce.shape, 0)
            masked = jnp.where(row < batch, bce, 0.0)
            loss_ref[...] += jnp.sum(masked, axis=0, keepdims=True)

        @pl.when(jnp.logical_not(needs_mask))
        def _():
            loss_ref[...] += jnp.sum(bce, axis=0, keepdims=True)
    else:
        loss_ref[...] += jnp.sum(bce, axis=0, keepdims=True)


def classification_objective_loss(source_embeddings, target_embeddings, labels,
                                  weight, bias, *, block_rows=1024,
                                  num_cores=_NUM_CORES):
    """source/target_embeddings: (B, 384) f32 or bf16 (bf16 on the wire halves HBM
    traffic for this bandwidth-bound kernel -- do NOT upcast on the host);
    labels: (B,); weight: (1, 1152); bias: (1,).

    block_rows: 1024 is safe on every generation; 2048-4096 gives a few % more on
    v6e/v7x (vmem_limit_bytes is derived from it below).  num_cores=2 splits the
    batch across v7x's two TensorCores; it is a harmless no-op on v5e/v6e.
    """
    B, D = source_embeddings.shape
    assert D == D_EMB
    assert target_embeddings.shape == (B, D)
    assert weight.shape == (1, 3 * D)

    tb = _round_up(min(block_rows, _round_up(B, 8)), 8)
    n_tiles = pl.cdiv(B, tb)
    ncores = max(1, min(num_cores, n_tiles))
    tiles_per_core = pl.cdiv(n_tiles, ncores)
    mask_possible = (B % tb != 0) or (ncores * tiles_per_core != n_tiles)

    # Small per-call reshapes/casts only (O(B) / O(1) bytes) -- no embedding copies.
    lab = labels.astype(jnp.float32).reshape(B, 1)
    w3 = weight.reshape(3, D).astype(jnp.float32)   # rows: [w_src, w_tgt, w_abs]
    b2 = bias.reshape(1, 1).astype(jnp.float32)

    # Explicit VMEM budget: src+tgt double-buffered in native dtype, lane-padded
    # labels, resident weight and per-core output blocks.  Capped below v7x's 64 MiB.
    itemsize = source_embeddings.dtype.itemsize
    vmem_bytes = (2 * 2 * tb * D * itemsize          # src + tgt, 2 buffers each
                  + 2 * tb * 128 * 4                 # (tb,1) labels, lane-padded, x2
                  + 2 * 8 * D * 4                    # weight (sublane-padded)
                  + 2 * 8 * 128 * 4)                 # output block
    vmem_limit = int(min(max(vmem_bytes + (8 << 20), 32 << 20), 60 << 20))

    kernel = functools.partial(_bce_head_kernel, batch=B, tile=tb,
                               tiles_per_core=tiles_per_core,
                               mask_possible=mask_possible)

    def row_map(c, i):
        # Clamp so tiles beyond the last real tile (possible when the core split is
        # uneven) DMA in-bounds data; the in-kernel row mask zeroes their contribution.
        return (jnp.minimum(c * tiles_per_core + i, n_tiles - 1), 0)

    out = pl.pallas_call(
        kernel,
        out_shape=jax.ShapeDtypeStruct((ncores * 8, 128), jnp.float32),
        grid_spec=pltpu.PrefetchScalarGridSpec(
            num_scalar_prefetch=0,
            grid=(ncores, tiles_per_core),
            in_specs=[
                pl.BlockSpec((tb, D), row_map),                    # src tile (native dtype)
                pl.BlockSpec((tb, D), row_map),                    # tgt tile (native dtype)
                pl.BlockSpec((tb, 1), row_map),                    # labels tile
                pl.BlockSpec((3, D), lambda c, i: (0, 0)),         # weight (resident)
                pl.BlockSpec((1, 1), lambda c, i: (0, 0),          # bias scalar in SMEM
                             memory_space=pltpu.MemorySpace.SMEM),
            ],
            out_specs=pl.BlockSpec((8, 128), lambda c, i: (c, 0)), # per-core partial sum
        ),
        compiler_params=pltpu.CompilerParams(
            dimension_semantics=("parallel", "arbitrary"),
            vmem_limit_bytes=vmem_limit,
        ),
    )(source_embeddings, target_embeddings, lab, w3, b2)

    # Every element of core c's (8,128) block holds that core's partial sum.
    return jnp.sum(out[0::8, 0]) * (1.0 / B)


def _reference(src, tgt, labels, weight, bias):
    src = src.astype(jnp.float32)
    tgt = tgt.astype(jnp.float32)
    cat = jnp.concatenate([src, tgt, jnp.abs(tgt - src)], axis=1)
    logits = cat @ weight.reshape(-1, 1).astype(jnp.float32) + bias.astype(jnp.float32)
    p = jax.nn.sigmoid(logits).reshape(-1)
    y = labels.astype(jnp.float32)
    log_p = jnp.maximum(jnp.log(p), -100.0)          # clamped like torch.nn.BCELoss
    log_1mp = jnp.maximum(jnp.log1p(-p), -100.0)
    return jnp.mean(-(y * log_p + (1.0 - y) * log_1mp))


if __name__ == "__main__":
    key = jax.random.PRNGKey(0)
    k_w, k_b = jax.random.split(key, 2)

    # Deterministic Linear(1152, 1) init (uniform(-1/sqrt(fan_in), ...), like torch).
    bound = 1.0 / jnp.sqrt(jnp.float32(3 * D_EMB))
    weight = jax.random.uniform(k_w, (1, 3 * D_EMB), jnp.float32, -bound, bound)
    bias = jax.random.uniform(k_b, (1,), jnp.float32, -bound, bound)

    def run_case(B, block_rows, dtype, tol):
        ks, kt, kl = jax.random.split(jax.random.fold_in(key, B), 3)
        src = jax.random.normal(ks, (B, D_EMB), jnp.float32).astype(dtype)
        tgt = jax.random.normal(kt, (B, D_EMB), jnp.float32).astype(dtype)
        labels = jax.random.bernoulli(kl, 0.5, (B,)).astype(jnp.int32)
        loss = jax.block_until_ready(
            classification_objective_loss(src, tgt, labels, weight, bias,
                                          block_rows=block_rows))
        ref = _reference(src, tgt, labels, weight, bias)
        assert jnp.allclose(loss, ref, atol=tol, rtol=tol), (B, dtype, loss, ref)

    run_case(10, 1024, jnp.float32, 1e-5)   # single partial tile (tail mask)
    run_case(40, 16, jnp.float32, 1e-5)     # multi-tile, uneven core split + tail mask
    run_case(64, 16, jnp.float32, 1e-5)     # multi-tile, exact fit (unmasked fast path)
    run_case(40, 16, jnp.bfloat16, 1e-4)    # native bf16 embeddings on the wire

    print("KERNEL_OK")
</pallas_src>

<mosaic_0001>
module attributes {stable_mosaic.version = 11 : i64} {
  func.func @_bce_head_kernel(%arg0: i32, %arg1: i32, %arg2: memref<16x384xf32, #tpu.memory_space<vmem>>, %arg3: memref<16x384xf32, #tpu.memory_space<vmem>>, %arg4: memref<16x1xf32, #tpu.memory_space<vmem>>, %arg5: memref<3x384xf32, #tpu.memory_space<vmem>>, %arg6: memref<1x1xf32, #tpu.memory_space<smem>>, %arg7: memref<8x128xf32, #tpu.memory_space<vmem>>) attributes {dimension_semantics = [#tpu.dimension_semantics<parallel>, #tpu.dimension_semantics<arbitrary>], iteration_bounds = array<i64: 1, 1>, scalar_prefetch = 0 : i64, scratch_operands = 0 : i64, tpu.core_type = #tpu.core_type<tc>, window_params = [{transform_indices = @transform_0, window_bounds = array<i64: 16, 384>}, {transform_indices = @transform_1, window_bounds = array<i64: 16, 384>}, {transform_indices = @transform_2, window_bounds = array<i64: 16, 1>}, {pipeline_mode = #tpu.pipeline_mode<synchronous>, transform_indices = @transform_3, window_bounds = array<i64: 3, 384>}, {transform_indices = @transform_4, window_bounds = array<i64: 1, 1>}, {transform_indices = @transform_5, window_bounds = array<i64: 8, 128>}]} {
    %c1_i32 = arith.constant 1 : i32
    %0 = arith.muli %arg0, %c1_i32 : i32
    %1 = arith.addi %0, %arg1 : i32
    %c0_i32 = arith.constant 0 : i32
    %2 = arith.cmpi eq, %arg1, %c0_i32 : i32
    %3 = arith.extui %2 : i1 to i32
    %c0_i32_0 = arith.constant 0 : i32
    %4 = arith.cmpi ne, %3, %c0_i32_0 : i32
    scf.if %4 {
      %cst_24 = arith.constant 0.000000e+00 : f32
      %63 = vector.broadcast %cst_24 : f32 to vector<8x128xf32>
      %c0_25 = arith.constant 0 : index
      %c0_26 = arith.constant 0 : index
      %64 = vector.load %arg7[%c0_25, %c0_26] : memref<8x128xf32, #tpu.memory_space<vmem>>, vector<8x128xf32>
      tpu.vector_store %arg7[%c0_25, %c0_26], %63 {strides = array<i32>} : memref<8x128xf32, #tpu.memory_space<vmem>>, vector<8x128xf32>,
    } else {
    }
    %c0 = arith.constant 0 : index
    %c0_1 = arith.constant 0 : index
    %5 = vector.load %arg2[%c0, %c0_1] : memref<16x384xf32, #tpu.memory_space<vmem>>, vector<16x384xf32>
    %c0_2 = arith.constant 0 : index
    %c0_3 = arith.constant 0 : index
    %6 = vector.load %arg3[%c0_2, %c0_3] : memref<16x384xf32, #tpu.memory_space<vmem>>, vector<16x384xf32>
    %c0_4 = arith.constant 0 : index
    %c0_5 = arith.constant 0 : index
    %7 = vector.load %arg5[%c0_4, %c0_5] : memref<3x384xf32, #tpu.memory_space<vmem>>, vector<3x384xf32>
    %8 = vector.extract_strided_slice %7 {offsets = [0, 0], sizes = [1, 384], strides = [1, 1]} : vector<3x384xf32> to vector<1x384xf32>
    %9 = vector.broadcast %8 : vector<1x384xf32> to vector<16x384xf32>
    %10 = arith.mulf %5, %9 : vector<16x384xf32>
    %11 = vector.extract_strided_slice %7 {offsets = [1, 0], sizes = [1, 384], strides = [1, 1]} : vector<3x384xf32> to vector<1x384xf32>
    %12 = vector.broadcast %11 : vector<1x384xf32> to vector<16x384xf32>
    %13 = arith.mulf %6, %12 : vector<16x384xf32>
    %14 = arith.addf %10, %13 : vector<16x384xf32>
    %15 = arith.subf %6, %5 : vector<16x384xf32>
    %16 = math.absf %15 : vector<16x384xf32>
    %17 = vector.extract_strided_slice %7 {offsets = [2, 0], sizes = [1, 384], strides = [1, 1]} : vector<3x384xf32> to vector<1x384xf32>
    %18 = vector.broadcast %17 : vector<1x384xf32> to vector<16x384xf32>
    %19 = arith.mulf %16, %18 : vector<16x384xf32>
    %20 = arith.addf %14, %19 : vector<16x384xf32>
    %cst = arith.constant dense<0.000000e+00> : vector<16xf32>
    %21 = vector.multi_reduction <add>, %20, %cst [1] : vector<16x384xf32> to vector<16xf32>
    %22 = vector.shape_cast %21 : vector<16xf32> to vector<16x1xf32>
    %c0_6 = arith.constant 0 : index
    %c0_7 = arith.constant 0 : index
    %23 = memref.load %arg6[%c0_6, %c0_7] : memref<1x1xf32, #tpu.memory_space<smem>>
    %24 = vector.broadcast %23 : f32 to vector<16x1xf32>
    %25 = arith.addf %22, %24 : vector<16x1xf32>
    %26 = math.absf %25 : vector<16x1xf32>
    %cst_8 = arith.constant 0.000000e+00 : f32
    %27 = vector.broadcast %cst_8 : f32 to vector<16x1xf32>
    %28 = arith.subf %27, %26 : vector<16x1xf32>
    %29 = math.exp %28 : vector<16x1xf32>
    %cst_9 = arith.constant 1.000000e+00 : f32
    %30 = vector.broadcast %cst_9 : f32 to vector<16x1xf32>
    %31 = arith.addf %30, %29 : vector<16x1xf32>
    %32 = math.log %31 : vector<16x1xf32>
    %cst_10 = arith.constant 0.000000e+00 : f32
    %33 = vector.broadcast %cst_10 : f32 to vector<16x1xf32>
    %34 = arith.subf %33, %25 : vector<16x1xf32>
    %cst_11 = arith.constant 0.000000e+00 : f32
    %35 = vector.broadcast %cst_11 : f32 to vector<16x1xf32>
    %36 = arith.maximumf %34, %35 : vector<16x1xf32>
    %37 = arith.addf %36, %32 : vector<16x1xf32>
    %cst_12 = arith.constant 0.000000e+00 : f32
    %38 = vector.broadcast %cst_12 : f32 to vector<16x1xf32>
    %39 = arith.subf %38, %37 : vector<16x1xf32>
    %cst_13 = arith.constant -1.000000e+02 : f32
    %40 = vector.broadcast %cst_13 : f32 to vector<16x1xf32>
    %41 = arith.maximumf %39, %40 : vector<16x1xf32>
    %cst_14 = arith.constant 0.000000e+00 : f32
    %42 = vector.broadcast %cst_14 : f32 to vector<16x1xf32>
    %43 = arith.maximumf %25, %42 : vector<16x1xf32>
    %44 = arith.addf %43, %32 : vector<16x1xf32>
    %cst_15 = arith.constant 0.000000e+00 : f32
    %45 = vector.broadcast %cst_15 : f32 to vector<16x1xf32>
    %46 = arith.subf %45, %44 : vector<16x1xf32>
    %cst_16 = arith.constant -1.000000e+02 : f32
    %47 = vector.broadcast %cst_16 : f32 to vector<16x1xf32>
    %48 = arith.maximumf %46, %47 : vector<16x1xf32>
    %c0_17 = arith.constant 0 : index
    %c0_18 = arith.constant 0 : index
    %49 = vector.load %arg4[%c0_17, %c0_18] : memref<16x1xf32, #tpu.memory_space<vmem>>, vector<16x1xf32>
    %cst_19 = arith.constant 5.000000e-01 : f32
    %50 = vector.broadcast %cst_19 : f32 to vector<16x1xf32>
    %51 = arith.cmpf ogt, %49, %50 : vector<16x1xf32>
    %52 = arith.select %51, %41, %48 : vector<16x1xi1>, vector<16x1xf32>
    %cst_20 = arith.constant 0.000000e+00 : f32
    %53 = vector.broadcast %cst_20 : f32 to vector<16x1xf32>
    %54 = arith.subf %53, %52 : vector<16x1xf32>
    %c1_i32_21 = arith.constant 1 : i32
    %55 = arith.addi %1, %c1_i32_21 : i32
    %c16_i32 = arith.constant 16 : i32
    %56 = arith.muli %55, %c16_i32 : i32
    %c10_i32 = arith.constant 10 : i32
    %57 = arith.cmpi sgt, %56, %c10_i32 : i32
    %58 = arith.extui %57 : i1 to i32
    %c0_i32_22 = arith.constant 0 : i32
    %59 = arith.cmpi ne, %58, %c0_i32_22 : i32
    scf.if %59 {
      %c16_i32_24 = arith.constant 16 : i32
      %63 = arith.muli %1, %c16_i32_24 : i32
      %64 = tpu.iota {dimensions = array<i32: 0>} : vector<16x1xi32>
      %65 = vector.broadcast %63 : i32 to vector<16x1xi32>
      %66 = arith.addi %65, %64 : vector<16x1xi32>
      %c10_i32_25 = arith.constant 10 : i32
      %67 = vector.broadcast %c10_i32_25 : i32 to vector<16x1xi32>
      %68 = arith.cmpi slt, %66, %67 : vector<16x1xi32>
      %cst_26 = arith.constant 0.000000e+00 : f32
      %69 = vector.broadcast %cst_26 : f32 to vector<16x1xf32>
      %70 = arith.select %68, %54, %69 : vector<16x1xi1>, vector<16x1xf32>
      %c0_27 = arith.constant 0 : index
      %c0_28 = arith.constant 0 : index
      %71 = vector.load %arg7[%c0_27, %c0_28] : memref<8x128xf32, #tpu.memory_space<vmem>>, vector<8x128xf32>
      %cst_29 = arith.constant dense<0.000000e+00> : vector<1xf32>
      %72 = vector.multi_reduction <add>, %70, %cst_29 [0] : vector<16x1xf32> to vector<1xf32>
      %73 = vector.shape_cast %72 : vector<1xf32> to vector<1x1xf32>
      %74 = vector.broadcast %73 : vector<1x1xf32> to vector<8x128xf32>
      %75 = arith.addf %71, %74 : vector<8x128xf32>
      %c0_30 = arith.constant 0 : index
      %c0_31 = arith.constant 0 : index
      %76 = vector.load %arg7[%c0_30, %c0_31] : memref<8x128xf32, #tpu.memory_space<vmem>>, vector<8x128xf32>
      tpu.vector_store %arg7[%c0_30, %c0_31], %75 {strides = array<i32>} : memref<8x128xf32, #tpu.memory_space<vmem>>, vector<8x128xf32>,
    } else {
    }
    %true = arith.constant true
    %60 = arith.xori %57, %true : i1
    %61 = arith.extui %60 : i1 to i32
    %c0_i32_23 = arith.constant 0 : i32
    %62 = arith.cmpi ne, %61, %c0_i32_23 : i32
    scf.if %62 {
      %c0_24 = arith.constant 0 : index
      %c0_25 = arith.constant 0 : index
      %63 = vector.load %arg7[%c0_24, %c0_25] : memref<8x128xf32, #tpu.memory_space<vmem>>, vector<8x128xf32>
      %cst_26 = arith.constant dense<0.000000e+00> : vector<1xf32>
      %64 = vector.multi_reduction <add>, %54, %cst_26 [0] : vector<16x1xf32> to vector<1xf32>
      %65 = vector.shape_cast %64 : vector<1xf32> to vector<1x1xf32>
      %66 = vector.broadcast %65 : vector<1x1xf32> to vector<8x128xf32>
      %67 = arith.addf %63, %66 : vector<8x128xf32>
      %c0_27 = arith.constant 0 : index
      %c0_28 = arith.constant 0 : index
      %68 = vector.load %arg7[%c0_27, %c0_28] : memref<8x128xf32, #tpu.memory_space<vmem>>, vector<8x128xf32>
      tpu.vector_store %arg7[%c0_27, %c0_28], %67 {strides = array<i32>} : memref<8x128xf32, #tpu.memory_space<vmem>>, vector<8x128xf32>,
    } else {
    }
    return
  }
  func.func @transform_0(%arg0: i32, %arg1: i32) -> (i32, i32) {
    %c1_i32 = arith.constant 1 : i32
    %0 = arith.muli %arg0, %c1_i32 : i32
    %1 = arith.addi %0, %arg1 : i32
    %c0_i32 = arith.constant 0 : i32
    %2 = arith.minsi %1, %c0_i32 : i32
    %c0_i32_0 = arith.constant 0 : i32
    %c0_i32_1 = arith.constant 0 : i32
    return %2, %c0_i32_0 : i32, i32
  }
  func.func @transform_1(%arg0: i32, %arg1: i32) -> (i32, i32) {
    %c1_i32 = arith.constant 1 : i32
    %0 = arith.muli %arg0, %c1_i32 : i32
    %1 = arith.addi %0, %arg1 : i32
    %c0_i32 = arith.constant 0 : i32
    %2 = arith.minsi %1, %c0_i32 : i32
    %c0_i32_0 = arith.constant 0 : i32
    %c0_i32_1 = arith.constant 0 : i32
    return %2, %c0_i32_0 : i32, i32
  }
  func.func @transform_2(%arg0: i32, %arg1: i32) -> (i32, i32) {
    %c1_i32 = arith.constant 1 : i32
    %0 = arith.muli %arg0, %c1_i32 : i32
    %1 = arith.addi %0, %arg1 : i32
    %c0_i32 = arith.constant 0 : i32
    %2 = arith.minsi %1, %c0_i32 : i32
    %c0_i32_0 = arith.constant 0 : i32
    %c0_i32_1 = arith.constant 0 : i32
    return %2, %c0_i32_0 : i32, i32
  }
  func.func @transform_3(%arg0: i32, %arg1: i32) -> (i32, i32) {
    %c0_i32 = arith.constant 0 : i32
    %c0_i32_0 = arith.constant 0 : i32
    %c0_i32_1 = arith.constant 0 : i32
    return %c0_i32, %c0_i32_0 : i32, i32
  }
  func.func @transform_4(%arg0: i32, %arg1: i32) -> (i32, i32) {
    %c0_i32 = arith.constant 0 : i32
    %c0_i32_0 = arith.constant 0 : i32
    %c0_i32_1 = arith.constant 0 : i32
    return %c0_i32, %c0_i32_0 : i32, i32
  }
  func.func @transform_5(%arg0: i32, %arg1: i32) -> (i32, i32) {
    %c0_i32 = arith.constant 0 : i32
    %c0_i32_0 = arith.constant 0 : i32
    return %arg0, %c0_i32 : i32, i32
  }
}

</mosaic_0001>

<bundles_post_ra>
// kernel: tpu_custom_call.1
= control target key start
LH: loop header
LB: loop body
LE: loop exit
PB: predicated region body
PF: predicated region fallthrough
CT: control target
= control target key end

     0   :  { %11 = vsyncpa [#allocation4], 0  ;;  %s491_s0 = inlined_call_operand.hbm [shape: f32[10,384], index: 0, kind: input, shape index: {}]   ;;  %s492_s1 = inlined_call_operand.hbm [shape: f32[10,384], index: 1, kind: input, shape index: {}]   ;;  %s493_s2 = inlined_call_operand.vmem [shape: f32[10,1], index: 2, kind: input, shape index: {}]   ;;  %s494_s3 = inlined_call_operand.vmem [shape: f32[3,384], index: 3, kind: input, shape index: {}]   ;;  %s495_s4 = inlined_call_operand.<no memory space> [shape: f32[1,1], index: 4, kind: input, shape index: {}]   ;;  %s496_s5 = inlined_call_operand.hbm [shape: f32[8,128], index: 5, kind: output, shape index: {}]  }
   0x1   :  { %12 = vsyncpa [#allocation7], 0 }
   0x2   :  { %13 = vsyncpa [#allocation5], 0  ;;  %s25_s20 = sshll.u32 %s491_s0, 4  ;;  %s431_s21 = smov [#allocation3]   ;;  %s26_s20 = int_to_ptr.hbm [resolvable:$true] %s25_s20 }
   0x3   :  { %s27_s22 = sshll.u32 %s431_s21, 4  ;;  %s45_s25 = sshll.u32 %s492_s1, 4  ;;  %s28_s22 = int_to_ptr.vmem [resolvable:$true] %s27_s22  ;;  %s46_s25 = int_to_ptr.hbm [resolvable:$true] %s45_s25 }
   0x4   :  { %s432_s26 = smov 384   ;;  %s433_s27 = smov 24  }
   0x5   :  { %33 = dma.hbm_to_vmem [thread:$0]  %s26_s20, 768, %s28_s22, [#allocation4], %s432_s26, %s432_s26, %s433_s27  }
   0x6   :  { %s434_s28 = smov [#allocation6]  }
   0x7   :  { %s47_s29 = sshll.u32 %s434_s28, 4  ;;  %s48_s29 = int_to_ptr.vmem [resolvable:$true] %s47_s29 }
   0x8   :  { %53 = dma.hbm_to_vmem [thread:$0]  %s46_s25, 768, %s48_s29, [#allocation7], %s432_s26, %s432_s26, %s433_s27  }
   0x9   :  { %425 = dma.done.wait [#allocation4], 768  }
   0xa   :  { %426 = vsyncadd [#allocation4], 4294966528 }
   0xb   :  { %427 = dma.done.wait [#allocation7], 768  }
   0xc   :  { %428 = vsyncadd [#allocation7], 4294966528  ;;  %v117_v0 = vld [vmem:[#allocation3 + $0x18] sm:$0xff]  ;;  %v118_v1 = vld [vmem:[#allocation3 + $0x20] sm:$0xff]  ;;  %vm269_vm3 = vcmask 7168   ;;  %s315_s14 = sshll.u32 %s496_s5, 4  ;;  %s316_s14 = int_to_ptr.hbm [resolvable:$true] %s315_s14 }
   0xd   :  { %v119_v2 = vld [vmem:[#allocation3 + $0x28] sm:$0xff]  ;;  %v124_v4 = vld [vmem:[#allocation6 + $0x20] sm:$0xff]  ;;  %v125_v5 = vld [vmem:[#allocation6 + $0x28] sm:$0xff] }
   0xe   :  { %v123_v3 = vld [vmem:[#allocation6 + $0x18] sm:$0xff]  ;;  %v126_v6 = vld [vmem:[%s494_s3] sm:$0x77]  ;;  %v170_v9 = vsub.f32 %v124_v4, %v118_v1  ;;  %v171_v10 = vsub.f32 %v125_v5, %v119_v2  ;;  %v120_v39 = vld [vmem:[#allocation6] sm:$0xff] }
   0xf   :  { %v127_v7 = vld [vmem:[%s494_s3 + $0x8] sm:$0x7]  ;;  %v169_v8 = vsub.f32 %v123_v3, %v117_v0  ;;  %v130_v11 = vperm.slane %v126_v6, 0  ;;  %v131_v12 = vperm.slane %v126_v6, 4  ;;  %v145_v14 = vperm.slane %v126_v6, 1  ;;  %v114_v35 = vld [vmem:[#allocation3] sm:$0xff] }
  0x10   :  { %v132_v13 = vperm.slane %v127_v7, 0  ;;  %v146_v15 = vperm.slane %v126_v6, 5  ;;  %v147_v16 = vperm.slane %v127_v7, 1  ;;  %v176_v18 = vand.u32 2147483647, %v170_v9  ;;  %v115_v36 = vld [vmem:[#allocation3 + $0x8] sm:$0xff] }
  0x11   :  { %v175_v17 = vand.u32 2147483647, %v169_v8  ;;  %v136_v19 = vperm.slane %v130_v11, 0  ;;  %v137_v20 = vperm.slane %v131_v12, 0  ;;  %v151_v22 = vperm.slane %v145_v14, 1  ;;  %v116_v46 = vld [vmem:[#allocation3 + $0x10] sm:$0xff] }
  0x12   :  { %v138_v21 = vperm.slane %v132_v13, 0  ;;  %v152_v23 = vperm.slane %v146_v15, 1  ;;  %v153_v24 = vperm.slane %v147_v16, 1  ;;  %v177_v25 = vand.u32 2147483647, %v171_v10  ;;  %v121_v47 = vld [vmem:[#allocation6 + $0x8] sm:$0xff] }
  0x13   :  { %v178_v26 = vperm.slane %v126_v6, 2  ;;  %v142_v27 = vmul.f32 %v136_v19, %v117_v0  ;;  %v143_v28 = vmul.f32 %v137_v20, %v118_v1  ;;  %v157_v30 = vmul.f32 %v151_v22, %v123_v3  ;;  %v122_v49 = vld [vmem:[#allocation6 + $0x10] sm:$0xff] }
  0x14   :  { %v144_v29 = vmul.f32 %v138_v21, %v119_v2  ;;  %v158_v31 = vmul.f32 %v152_v23, %v124_v4  ;;  %v159_v32 = vmul.f32 %v153_v24, %v125_v5  ;;  %v179_v33 = vperm.slane %v126_v6, 6 }
  0x15   :  { %v180_v34 = vperm.slane %v127_v7, 2  ;;  %v163_v37 = vadd.f32 %v157_v30, %v142_v27  ;;  %v184_v38 = vperm.slane %v178_v26, 2  ;;  %v139_v40 = vmul.f32 %v136_v19, %v114_v35 }
  0x16   :  { %v140_v41 = vmul.f32 %v137_v20, %v115_v36  ;;  %v164_v42 = vadd.f32 %v158_v31, %v143_v28  ;;  %v165_v43 = vadd.f32 %v159_v32, %v144_v29  ;;  %v185_v44 = vperm.slane %v179_v33, 2 }
  0x17   :  { %v186_v45 = vperm.slane %v180_v34, 2  ;;  %v190_v48 = vmul.f32 %v184_v38, %v175_v17  ;;  %v141_v50 = vmul.f32 %v138_v21, %v116_v46  ;;  %v154_v51 = vmul.f32 %v151_v22, %v120_v39 }
  0x18   :  { %v155_v52 = vmul.f32 %v152_v23, %v121_v47  ;;  %v191_v53 = vmul.f32 %v185_v44, %v176_v18  ;;  %v156_v55 = vmul.f32 %v153_v24, %v122_v49  ;;  %v166_v56 = vsub.f32 %v120_v39, %v114_v35 }
  0x19   :  { %v192_v54 = vmul.f32 %v186_v45, %v177_v25  ;;  %v196_v57 = vadd.f32 %v190_v48, %v163_v37  ;;  %v167_v58 = vsub.f32 %v121_v47, %v115_v36  ;;  %v168_v61 = vsub.f32 %v122_v49, %v116_v46 }
  0x1a   :  { %v197_v59 = vadd.f32 %v191_v53, %v164_v42  ;;  %v160_v62 = vadd.f32 %v154_v51, %v139_v40  ;;  %v161_v63 = vadd.f32 %v155_v52, %v140_v41  ;;  %v172_v0 = vand.u32 2147483647, %v166_v56  ;;  %v243_v53 = vld [vmem:[%s493_s2] sm:$0xff] }
  0x1b   :  { %v198_v60 = vadd.f32 %v192_v54, %v165_v43  ;;  %v173_v1 = vand.u32 2147483647, %v167_v58  ;;  %v162_v3 = vadd.f32 %v156_v55, %v141_v50  ;;  %v174_v4 = vand.u32 2147483647, %v168_v61 }
  0x1c   :  { %v203_v2 = vadd.f32 %v197_v59, %v196_v57  ;;  %v187_v5 = vmul.f32 %v184_v38, %v172_v0  ;;  %v208_v14 = vstv %s495_s4  ;;  %v435_v21 = vmov 0   ;;  %v244_v38 = vld [vmem:[%s493_s2 + $0x8] sm:$0xff]  ;;  %s436_s2 = smov [#allocation8]  }
  0x1d   :  { %v188_v6 = vmul.f32 %v185_v44, %v173_v1  ;;  %v189_v8 = vmul.f32 %v186_v45, %v174_v4  ;;  %343 = vset.pattern.permute.xlu1 %v435_v21  ;;  %344 = vset.pattern.permute.xlu0 %v435_v21  ;;  %v258_v35 = vlaneseq  ;;  %vm246_vm0 = vcmp.gt.f32.partialorder %v244_v38, 0.5  ;;  %s313_s11 = sshll.u32 %s436_s2, 4  ;;  %s314_s11 = int_to_ptr.vmem [resolvable:$true] %s313_s11 }
  0x1e   :  { %v204_v7 = vadd.f32 %v203_v2, %v198_v60  ;;  %v193_v9 = vadd.f32 %v187_v5, %v160_v62  ;;  %vm245_vm1 = vcmp.gt.f32.partialorder %v243_v53, 0.5 }
  0x1f   :  { %v194_v10 = vadd.f32 %v188_v6, %v161_v63  ;;  %v195_v11 = vadd.f32 %v189_v8, %v162_v3  ;;  %v259_v42 = vshrl.u32 %v258_v35, 7 }
  0x20   :  { %205 = vadd.xlane.f32.xlu0 %v204_v7 }
  0x21   :  { %v199_v12 = vadd.f32 %v194_v10, %v193_v9  ;;  %v260_v50 = vadd.s32 8, %v259_v42 }
  0x23   :  { %v200_v13 = vadd.f32 %v199_v12, %v195_v11  ;;  %vm265_vm2 = vcmp.lt.s32.totalorder %v260_v50, 10 }
  0x28   :  { %201 = vadd.xlane.f32.xlu0 %v200_v13 }
  0x93   :  { %v206_v15 = vpop.xlane.xlu0 %205 }
  0x94   :  { %v210_v16 = vadd.f32 %v208_v14, %v206_v15 }
  0x96   :  { %v212_v17 = vand.u32 2147483647, %v210_v16  ;;  %v226_v28 = vsub.f32 0.0, %v210_v16  ;;  %v236_v34 = vmax.f32 %v210_v16, 0.0 }
  0x98   :  { %v214_v18 = vsub.f32 0.0, %v212_v17  ;;  %v228_v33 = vmax.f32 %v226_v28, 0.0 }
  0x9a   :  { %v217_v19 = vmul.f32 1.442695, %v214_v18 }
  0x9b   :  { %v202_v20 = vpop.xlane.xlu0 %201 }
  0x9c   :  { %345 = vpow2.f32 %v217_v19  ;;  %v209_v22 = vadd.f32 %v208_v14, %v202_v20 }
  0x9e   :  { %v211_v23 = vand.u32 2147483647, %v209_v22  ;;  %v225_v41 = vsub.f32 0.0, %v209_v22  ;;  %v235_v48 = vmax.f32 %v209_v22, 0.0 }
  0xa0   :  { %v213_v24 = vsub.f32 0.0, %v211_v23  ;;  %v227_v47 = vmax.f32 %v225_v41, 0.0 }
  0xa2   :  { %v346_v25 = vpop.eup %345  ;;  %v215_v26 = vmul.f32 1.442695, %v213_v24 }
  0xa3   :  { %v220_v27 = vadd.f32 1.0, %v346_v25 }
  0xa4   :  { %347 = vpow2.f32 %v215_v26 }
  0xa5   :  { %349 = vlog2.f32 %v220_v27 }
  0xaa   :  { %v348_v29 = vpop.eup %347 }
  0xab   :  { %v350_v30 = vpop.eup %349  ;;  %v219_v31 = vadd.f32 1.0, %v348_v29 }
  0xac   :  { %v224_v32 = vmul.f32 0.6931472, %v350_v30 }
  0xad   :  { %351 = vlog2.f32 %v219_v31 }
  0xae   :  { %v230_v36 = vadd.f32 %v228_v33, %v224_v32  ;;  %v238_v37 = vadd.f32 %v236_v34, %v224_v32 }
  0xb0   :  { %v232_v39 = vsub.f32 0.0, %v230_v36  ;;  %v240_v40 = vsub.f32 0.0, %v238_v37 }
  0xb2   :  { %v234_v43 = vmax.f32 %v232_v39, -100.0  ;;  %v242_v44 = vmax.f32 %v240_v40, -100.0 }
  0xb3   :  { %v352_v45 = vpop.eup %351 }
  0xb4   :  { %v222_v46 = vmul.f32 0.6931472, %v352_v45  ;;  %v248_v49 = vsel %vm246_vm0, %v234_v43, %v242_v44 }
  0xb5   :  { %v250_v56 = vsub.f32 0.0, %v248_v49 }
  0xb6   :  { %v229_v51 = vadd.f32 %v227_v47, %v222_v46  ;;  %v237_v52 = vadd.f32 %v235_v48, %v222_v46 }
  0xb7   :  { %v267_v60 = vsel %vm265_vm2, %v250_v56, 0.0 }
  0xb8   :  { %v231_v54 = vsub.f32 0.0, %v229_v51  ;;  %v239_v55 = vsub.f32 0.0, %v237_v52  ;;  %v271_v63 = vsel %vm269_vm3, %v267_v60, 0.0 }
  0xba   :  { %v233_v57 = vmax.f32 %v231_v54, -100.0  ;;  %v241_v58 = vmax.f32 %v239_v55, -100.0 }
  0xbc   :  { %v247_v59 = vsel %vm245_vm1, %v233_v57, %v241_v58 }
  0xbd   :  { %v249_v61 = vsub.f32 0.0, %v247_v59 }
  0xbf   :  { %v270_v62 = vsel %vm269_vm3, %v249_v61, 0.0 }
  0xc0   :  { %v272_v0 = vadd.f32 %v271_v63, %v270_v62 }
  0xc2   :  { %v273_v1 = vrot.slane %v272_v0, 4 }
  0xc4   :  { %v274_v2 = vadd.f32 %v273_v1, %v272_v0 }
  0xc6   :  { %v275_v3 = vrot.slane %v274_v2, 2 }
  0xc8   :  { %v276_v4 = vadd.f32 %v275_v3, %v274_v2 }
  0xca   :  { %v277_v5 = vrot.slane %v276_v4, 1 }
  0xcc   :  { %v278_v6 = vadd.f32 %v277_v5, %v276_v4 }
  0xce   :  { %281 = vperm.xlu1 %343, %v278_v6  }
 0x140   :  { %v282_v7 = vpop.permute.xlu1 %281 }
 0x141   :  { %285 = vst [vmem:[#allocation8] sm:$0xff] %v282_v7 }
 0x142   :  { %318 = dma.vmem_to_hbm [thread:$0]  %s314_s11, 128, %s316_s14, [#allocation5]  }
 0x143   :  { %429 = dma.done.wait [#allocation5], 128  }
 0x144   :  { %430 = vsyncadd [#allocation5], 4294967168 }
 0x145   :  { %323 = vsyncpa [#allocation4], 1 }
 0x146   :  { %324 = vsyncpa [#allocation7], 1 }
 0x147   :  { %325 = vsyncpa [#allocation5], 1 }

</bundles_post_ra>
